<compile_context>
chip_gen: v6e
topology: v6e:2x2x1
jax: 0.10.0
libtpu: 0.0.40
codegen_flags: <defaults>
</compile_context>

<pallas_src>
import functools

import jax
import jax.numpy as jnp
from jax.experimental import pallas as pl
from jax.experimental.pallas import tpu as pltpu


_TM_MAX = 512
_TN_MAX = 512
_TK_MAX = 2048
_VMEM_LIMIT = 48 * 1024 * 1024  # safe on v7x (64 MiB phys), fine on v5e/v6e


def _round_up(x, m):
    return ((x + m - 1) // m) * m


def _sublane_multiple(dtype):
    bits = jnp.dtype(dtype).itemsize * 8
    if bits >= 32:
        return 8
    if bits == 16:
        return 16
    return 32


def _tile_nk(num_classes, input_size):
    tn = min(_TN_MAX, _round_up(num_classes, 128))
    tk = min(_TK_MAX, _round_up(input_size, 128))
    return tn, tk


# ---------------------------------------------------------------------------
# Kernels
# ---------------------------------------------------------------------------
def _linear_bias_kernel_f32out(x_ref, wt_ref, b_ref, o_ref):
    """f32 output: accumulate directly into the K-resident output block."""
    k = pl.program_id(2)

    @pl.when(k == 0)
    def _init():
        # Fold the bias into the init (broadcast over rows); no separate epilogue.
        o_ref[...] = jnp.broadcast_to(b_ref[...], o_ref.shape)

    # Weight is pre-transposed to (K, N) at prepare time -> no in-kernel transpose.
    o_ref[...] += jnp.dot(
        x_ref[...], wt_ref[...], preferred_element_type=jnp.float32
    )


def _linear_bias_kernel_acc(x_ref, wt_ref, b_ref, o_ref, acc_ref):
    """Narrow output dtypes: f32 VMEM accumulator, cast once in the epilogue."""
    k = pl.program_id(2)

    @pl.when(k == 0)
    def _init():
        acc_ref[...] = jnp.broadcast_to(b_ref[...], acc_ref.shape)

    acc_ref[...] += jnp.dot(
        x_ref[...], wt_ref[...], preferred_element_type=jnp.float32
    )

    @pl.when(k == pl.num_programs(2) - 1)
    def _finalize():
        o_ref[...] = acc_ref[...].astype(o_ref.dtype)


# ---------------------------------------------------------------------------
# One-time parameter preparation (do this at load time, NOT per forward call)
# ---------------------------------------------------------------------------
def prepare_params(weight, bias, *, compute_dtype=None):
    """Transpose to (H, C), zero-pad to tile-aligned lane-dense shapes, optionally
    cast the weight to the MXU compute dtype.  Persist the results; the per-call
    wrapper never touches the weight again (saves a full HBM pass per call)."""
    C, H = weight.shape
    tn, tk = _tile_nk(C, H)
    Cp, Hp = _round_up(C, tn), _round_up(H, tk)
    wt = jnp.pad(weight.T, ((0, Hp - H), (0, Cp - C)))  # (Hp, Cp), MXU-native RHS
    if compute_dtype is not None:
        wt = wt.astype(compute_dtype)
    b = jnp.pad(bias.astype(jnp.float32).reshape(1, C), ((0, 0), (0, Cp - C)))
    return wt, b


# ---------------------------------------------------------------------------
# Forward
# ---------------------------------------------------------------------------
@functools.partial(jax.jit, static_argnames=("num_classes",))
def multiclass_head(x, wt_p, bias_p, *, num_classes):
    """y = x @ weight.T + bias (torch.nn.Linear forward) using prepared params."""
    B, H = x.shape
    Hp, Cp = wt_p.shape
    assert Hp >= H and Cp >= num_classes, "prepared params do not match x"
    out_dtype = x.dtype
    compute_dtype = wt_p.dtype

    # Tile selection (generation-safe, 128-aligned lanes, dtype-native sublanes).
    sub = _sublane_multiple(compute_dtype)
    tm = min(_TM_MAX, _round_up(B, sub))
    Bp = _round_up(B, tm)
    tn = min(_TN_MAX, Cp)
    tk = min(_TK_MAX, Hp)

    grid_m, grid_n, grid_k = Bp // tm, Cp // tn, Hp // tk

    # v7x megacore: don't let the two parallel axes collapse to 1x1 (one TC idle).
    if grid_m == 1 and grid_n == 1 and Cp > 128:
        tn = Cp // 2 if (Cp % 256 == 0) else 128
        grid_n = Cp // tn

    # Only x is padded per call (M to the tile, K to the prepared weight's Hp).
    x_p = x
    if Bp != B or Hp != H:
        x_p = jnp.pad(x, ((0, Bp - B), (0, Hp - H)))
    if x_p.dtype != compute_dtype:
        x_p = x_p.astype(compute_dtype)

    # Actual kernel HBM traffic: x re-read grid_n times, W (+bias) re-read grid_m
    # times, output written once.
    cost = pl.CostEstimate(
        flops=2 * Bp * Hp * Cp,
        transcendentals=0,
        bytes_accessed=(
            x_p.size * x_p.dtype.itemsize * grid_n
            + wt_p.size * wt_p.dtype.itemsize * grid_m
            + bias_p.size * bias_p.dtype.itemsize * grid_m
            + Bp * Cp * jnp.dtype(out_dtype).itemsize
        ),
    )

    if jnp.dtype(out_dtype) == jnp.dtype(jnp.float32):
        kernel = _linear_bias_kernel_f32out
        scratch_shapes = []
    else:
        kernel = _linear_bias_kernel_acc
        scratch_shapes = [pltpu.VMEM((tm, tn), jnp.float32)]

    out_p = pl.pallas_call(
        kernel,
        out_shape=jax.ShapeDtypeStruct((Bp, Cp), out_dtype),
        grid=(grid_m, grid_n, grid_k),
        in_specs=[
            pl.BlockSpec((tm, tk), lambda i, j, k: (i, k)),   # x tile
            pl.BlockSpec((tk, tn), lambda i, j, k: (k, j)),   # W.T tile (K, N)
            pl.BlockSpec((1, tn), lambda i, j, k: (0, j)),    # bias tile (f32)
        ],
        out_specs=pl.BlockSpec((tm, tn), lambda i, j, k: (i, j)),
        scratch_shapes=scratch_shapes,
        compiler_params=pltpu.CompilerParams(
            dimension_semantics=("parallel", "parallel", "arbitrary"),
            vmem_limit_bytes=_VMEM_LIMIT,
        ),
        cost_estimate=cost,
    )(x_p, wt_p, bias_p)

    return out_p[:B, :num_classes]


def init_params(key, input_size, num_classes, dtype=jnp.float32):
    """Deterministic init mimicking torch.nn.Linear default (uniform +/- 1/sqrt(in))."""
    kw, kb = jax.random.split(key)
    bound = 1.0 / (input_size ** 0.5)
    weight = jax.random.uniform(
        kw, (num_classes, input_size), dtype=dtype, minval=-bound, maxval=bound
    )
    bias = jax.random.uniform(
        kb, (num_classes,), dtype=dtype, minval=-bound, maxval=bound
    )
    return weight, bias


if __name__ == "__main__":
    key = jax.random.PRNGKey(0)
    kx, kp = jax.random.split(key)

    batch = 2
    input_size = 32
    num_classes = 8

    x = jax.random.normal(kx, (batch, input_size), dtype=jnp.float32)
    weight, bias = init_params(kp, input_size, num_classes)

    # Reference (same math as torch.nn.Linear forward).
    y_ref = x @ weight.T + bias

    # f32 compute path (exact).
    wt_p, b_p = prepare_params(weight, bias)
    y = multiclass_head(x, wt_p, b_p, num_classes=num_classes)
    y = jax.block_until_ready(y)
    assert y.shape == (batch, num_classes)
    assert jnp.allclose(y, y_ref, atol=1e-5, rtol=1e-5), "f32 mismatch vs reference"

    # bf16 compute path (recommended default on v5e/v6e); accumulation stays f32.
    wt_bf, b_bf = prepare_params(weight, bias, compute_dtype=jnp.bfloat16)
    y_bf = multiclass_head(x, wt_bf, b_bf, num_classes=num_classes)
    y_bf = jax.block_until_ready(y_bf)
    assert y_bf.shape == (batch, num_classes)
    assert jnp.allclose(y_bf, y_ref, atol=2e-2, rtol=2e-2), "bf16 mismatch vs reference"

    print("KERNEL_OK")
</pallas_src>

<mosaic_0001>
module attributes {stable_mosaic.version = 11 : i64} {
  func.func @_linear_bias_kernel_f32out(%arg0: i32, %arg1: i32, %arg2: i32, %arg3: memref<8x128xf32, #tpu.memory_space<vmem>>, %arg4: memref<128x128xf32, #tpu.memory_space<vmem>>, %arg5: memref<1x128xf32, #tpu.memory_space<vmem>>, %arg6: memref<8x128xf32, #tpu.memory_space<vmem>>) attributes {dimension_semantics = [#tpu.dimension_semantics<parallel>, #tpu.dimension_semantics<parallel>, #tpu.dimension_semantics<arbitrary>], iteration_bounds = array<i64: 1, 1, 1>, scalar_prefetch = 0 : i64, scratch_operands = 0 : i64, tpu.core_type = #tpu.core_type<tc>, window_params = [{transform_indices = @transform_0, window_bounds = array<i64: 8, 128>}, {transform_indices = @transform_1, window_bounds = array<i64: 128, 128>}, {transform_indices = @transform_2, window_bounds = array<i64: 1, 128>}, {transform_indices = @transform_3, window_bounds = array<i64: 8, 128>}]} {
    %c0_i32 = arith.constant 0 : i32
    %0 = arith.cmpi eq, %arg2, %c0_i32 : i32
    %1 = arith.extui %0 : i1 to i32
    %c0_i32_0 = arith.constant 0 : i32
    %2 = arith.cmpi ne, %1, %c0_i32_0 : i32
    scf.if %2 {
      %c0_8 = arith.constant 0 : index
      %c0_9 = arith.constant 0 : index
      %9 = vector.load %arg5[%c0_8, %c0_9] : memref<1x128xf32, #tpu.memory_space<vmem>>, vector<1x128xf32>
      %10 = vector.shape_cast %9 : vector<1x128xf32> to vector<1x128xf32>
      %11 = vector.broadcast %10 : vector<1x128xf32> to vector<8x128xf32>
      %c0_10 = arith.constant 0 : index
      %c0_11 = arith.constant 0 : index
      %12 = vector.load %arg6[%c0_10, %c0_11] : memref<8x128xf32, #tpu.memory_space<vmem>>, vector<8x128xf32>
      tpu.vector_store %arg6[%c0_10, %c0_11], %11 {strides = array<i32>} : memref<8x128xf32, #tpu.memory_space<vmem>>, vector<8x128xf32>,
    } else {
    }
    %c0 = arith.constant 0 : index
    %c0_1 = arith.constant 0 : index
    %3 = vector.load %arg6[%c0, %c0_1] : memref<8x128xf32, #tpu.memory_space<vmem>>, vector<8x128xf32>
    %c0_2 = arith.constant 0 : index
    %c0_3 = arith.constant 0 : index
    %4 = vector.load %arg3[%c0_2, %c0_3] : memref<8x128xf32, #tpu.memory_space<vmem>>, vector<8x128xf32>
    %c0_4 = arith.constant 0 : index
    %c0_5 = arith.constant 0 : index
    %5 = vector.load %arg4[%c0_4, %c0_5] : memref<128x128xf32, #tpu.memory_space<vmem>>, vector<128x128xf32>
    %cst = arith.constant dense<0.000000e+00> : vector<8x128xf32>
    %6 = tpu.matmul %4, %5, %cst {dimension_numbers = #tpu.dot_dimension_numbers<[1], [0], [0], [1], [0, 0, 1, 1], [], []>} : vector<8x128xf32>, vector<128x128xf32>, vector<8x128xf32> -> vector<8x128xf32>
    %7 = arith.addf %3, %6 : vector<8x128xf32>
    %c0_6 = arith.constant 0 : index
    %c0_7 = arith.constant 0 : index
    %8 = vector.load %arg6[%c0_6, %c0_7] : memref<8x128xf32, #tpu.memory_space<vmem>>, vector<8x128xf32>
    tpu.vector_store %arg6[%c0_6, %c0_7], %7 {strides = array<i32>} : memref<8x128xf32, #tpu.memory_space<vmem>>, vector<8x128xf32>,
    return
  }
  func.func @transform_0(%arg0: i32, %arg1: i32, %arg2: i32) -> (i32, i32) {
    %c0_i32 = arith.constant 0 : i32
    return %arg0, %arg2 : i32, i32
  }
  func.func @transform_1(%arg0: i32, %arg1: i32, %arg2: i32) -> (i32, i32) {
    %c0_i32 = arith.constant 0 : i32
    return %arg2, %arg1 : i32, i32
  }
  func.func @transform_2(%arg0: i32, %arg1: i32, %arg2: i32) -> (i32, i32) {
    %c0_i32 = arith.constant 0 : i32
    %c0_i32_0 = arith.constant 0 : i32
    return %c0_i32, %arg1 : i32, i32
  }
  func.func @transform_3(%arg0: i32, %arg1: i32, %arg2: i32) -> (i32, i32) {
    %c0_i32 = arith.constant 0 : i32
    return %arg0, %arg1 : i32, i32
  }
}

</mosaic_0001>

<bundles_post_ra>
// kernel: multiclass_head.1
= control target key start
LH: loop header
LB: loop body
LE: loop exit
PB: predicated region body
PF: predicated region fallthrough
CT: control target
= control target key end

     0   :  { %8 = vsyncpa [#allocation3], 0  ;;  %s215_s12 = smov [#allocation2]   ;;  %s252_s0 = inlined_call_operand.vmem [shape: f32[8,128], index: 0, kind: input, shape index: {}]   ;;  %s253_s1 = inlined_call_operand.hbm [shape: f32[128,128], index: 1, kind: input, shape index: {}]   ;;  %s254_s2 = inlined_call_operand.vmem [shape: f32[1,128], index: 2, kind: input, shape index: {}]   ;;  %s255_s3 = inlined_call_operand.vmem [shape: f32[8,128], index: 3, kind: output, shape index: {}]  }
   0x1   :  { %s16_s13 = sshll.u32 %s215_s12, 4  ;;  %s17_s13 = int_to_ptr.vmem [resolvable:$true] %s16_s13 }
   0x2   :  { %s201_s14 = scalar_lea.vmem %s17_s13, 2048  ;;  %p206_p1 = scmp.lt.s32.totalorder %s17_s13, %s17_s13 }
   0x3   :  { %p202_p0 = scmp.ne.s32.totalorder %s17_s13, %s201_s14  ;;  %p207_p2 = scmp.lt.s32.totalorder %s201_s14, %s201_s14 }
   0x5   :  { %p208_p3 = por %p207_p2, %p206_p1 }
   0x7   :  { %p209_p4 = pnand %p208_p3, %p202_p0 }
   0x9   :  { %212 = shalt.err (!%p209_p4)
}
   0xa   :  { %s216_s15 = smov 128   ;;  %s217_s16 = smov 8  }
   0xb   :  { %22 = dma.hbm_to_vmem [thread:$0]  %s253_s1, 2048, %s17_s13, [#allocation3], %s216_s15, %s216_s15, %s217_s16  }
   0xc   :  { %213 = dma.done.wait [#allocation3], 2048  }
   0xd   :  { %214 = vsyncadd [#allocation3], 4294965248  ;;  %v218_v0 = vmov 0.0   ;;  %vm219_vm0 = vmmov 0   ;;  %v57_v1 = vld [vmem:[#allocation2 + $0x78] sm:$0xff]  ;;  %v56_v2 = vld [vmem:[#allocation2 + $0x70] sm:$0xff] }
   0xe   :  { %153 = vmatprep.subr.mxu0 %v218_v0  ;;  %185 = vmatprep.mubr.msk.f32.mxu0 %vm219_vm0, %v218_v0  ;;  %v55_v3 = vld [vmem:[#allocation2 + $0x68] sm:$0xff]  ;;  %v54_v4 = vld [vmem:[#allocation2 + $0x60] sm:$0xff]  ;;  %v53_v5 = vld [vmem:[#allocation2 + $0x58] sm:$0xff] }
   0xf   :  { %154 = vmatpush3.msra.mxu0 %v57_v1  ;;  %v52_v6 = vld [vmem:[#allocation2 + $0x50] sm:$0xff]  ;;  %v51_v7 = vld [vmem:[#allocation2 + $0x48] sm:$0xff]  ;;  %v50_v8 = vld [vmem:[#allocation2 + $0x40] sm:$0xff] }
  0x10   :  { %155 = vmatprep.subr.mxu0 %v218_v0  ;;  %v49_v9 = vld [vmem:[#allocation2 + $0x38] sm:$0xff]  ;;  %v48_v10 = vld [vmem:[#allocation2 + $0x30] sm:$0xff]  ;;  %v47_v11 = vld [vmem:[#allocation2 + $0x28] sm:$0xff] }
  0x11   :  { %156 = vmatpush3.msra.mxu0 %v56_v2  ;;  %v46_v12 = vld [vmem:[#allocation2 + $0x20] sm:$0xff]  ;;  %v45_v13 = vld [vmem:[#allocation2 + $0x18] sm:$0xff]  ;;  %v44_v14 = vld [vmem:[#allocation2 + $0x10] sm:$0xff] }
  0x12   :  { %157 = vmatprep.subr.mxu0 %v218_v0  ;;  %v43_v15 = vld [vmem:[#allocation2 + $0x8] sm:$0xff]  ;;  %v42_v16 = vld [vmem:[#allocation2] sm:$0xff] }
  0x13   :  { %158 = vmatpush3.msra.mxu0 %v55_v3  ;;  %v41_v17 = vld [vmem:[%s252_s0] sm:$0xff] }
  0x14   :  { %159 = vmatprep.subr.mxu0 %v218_v0  ;;  %v135_v18 = vld [vmem:[%s254_s2] ss:$0 sm:$0xff] }
  0x15   :  { %160 = vmatpush3.msra.mxu0 %v54_v4 }
  0x16   :  { %161 = vmatprep.subr.mxu0 %v218_v0 }
  0x17   :  { %162 = vmatpush3.msra.mxu0 %v53_v5 }
  0x18   :  { %163 = vmatprep.subr.mxu0 %v218_v0 }
  0x19   :  { %164 = vmatpush3.msra.mxu0 %v52_v6 }
  0x1a   :  { %165 = vmatprep.subr.mxu0 %v218_v0 }
  0x1b   :  { %166 = vmatpush3.msra.mxu0 %v51_v7 }
  0x1c   :  { %167 = vmatprep.subr.mxu0 %v218_v0 }
  0x1d   :  { %168 = vmatpush3.msra.mxu0 %v50_v8 }
  0x1e   :  { %169 = vmatprep.subr.mxu0 %v218_v0 }
  0x1f   :  { %170 = vmatpush3.msra.mxu0 %v49_v9 }
  0x20   :  { %171 = vmatprep.subr.mxu0 %v218_v0 }
  0x21   :  { %172 = vmatpush3.msra.mxu0 %v48_v10 }
  0x22   :  { %173 = vmatprep.subr.mxu0 %v218_v0 }
  0x23   :  { %174 = vmatpush3.msra.mxu0 %v47_v11 }
  0x24   :  { %175 = vmatprep.subr.mxu0 %v218_v0 }
  0x25   :  { %176 = vmatpush3.msra.mxu0 %v46_v12 }
  0x26   :  { %177 = vmatprep.subr.mxu0 %v218_v0 }
  0x27   :  { %178 = vmatpush3.msra.mxu0 %v45_v13 }
  0x28   :  { %179 = vmatprep.subr.mxu0 %v218_v0 }
  0x29   :  { %180 = vmatpush3.msra.mxu0 %v44_v14 }
  0x2a   :  { %181 = vmatprep.subr.mxu0 %v218_v0 }
  0x2b   :  { %182 = vmatpush3.msra.mxu0 %v43_v15 }
  0x2c   :  { %183 = vmatprep.subr.mxu0 %v218_v0 }
  0x2d   :  { %184 = vmatpush3.msra.mxu0 %v42_v16 }
  0x2e   :  { %186 = vmatmul.mubr.f32.vlgmr.msra.gmra.mxu0 %v41_v17 }
  0xee   :  { %v124_v19 = vpop.f32.mrf.mxu0 }
  0xef   :  { %v128_v20 = vadd.f32 %v135_v18, %v124_v19 }
  0xf0   :  { %v187_v21 = vpop.f32.mrf.mxu0 }
  0xf1   :  { %129 = vst [vmem:[%s255_s3] sm:$0xff] %v128_v20 }
  0xf2   :  { %134 = vsyncpa [#allocation3], 1 }

</bundles_post_ra>
